<compile_context>
chip_gen: v6e
topology: v6e:2x2x1
jax: 0.10.0
libtpu: 0.0.40
codegen_flags: <defaults>
</compile_context>

<pallas_src>
import functools

import jax
import jax.numpy as jnp
from jax.experimental import pallas as pl
from jax.experimental.pallas import tpu as pltpu


# ----------------------------------------------------------------------------
# generation-aware knobs
# ----------------------------------------------------------------------------
def _tpu_kind():
    try:
        return jax.devices()[0].device_kind.lower()
    except Exception:
        return ""


_KIND = _tpu_kind()
_IS_V7 = "v7" in _KIND
_BF16_ELEMENTWISE = ("v6" in _KIND) or _IS_V7       # v5e has no bf16 VPU -> keep f32 path
if _IS_V7:                                          # 64 MiB physical VMEM per TensorCore
    _ROW_BUDGET = 20 * 2**20
    _VMEM_CAP = 48 * 2**20
    _DEFAULT_MAX_ROWS = 1024
else:                                               # v5e / v6e: 128 MiB physical VMEM
    _ROW_BUDGET = 48 * 2**20
    _VMEM_CAP = 96 * 2**20
    _DEFAULT_MAX_ROWS = 2048


# ----------------------------------------------------------------------------
# small helpers
# ----------------------------------------------------------------------------
def _round_up(x, m):
    return (x + m - 1) // m * m


def _pick_rows(M, row_bytes, max_rows, budget):
    """Pick an M-tile (multiple of 16 for bf16 sublane packing) whose double-buffered
    footprint fits `budget`; returns (tile_rows, padded_M)."""
    tm = budget // max(2 * row_bytes, 1)
    tm = max(16, min(max_rows, tm))
    tm = (tm // 16) * 16
    if M <= tm:
        return M, M                       # single block == full array dims
    return tm, _round_up(M, tm)


# ----------------------------------------------------------------------------
# Pallas kernel: fused (activation -> bf16 matmul -> bias -> tanh -> BN stats),
# tiled over M.  BN statistics accumulate in resident (1, Ncp) output blocks.
# ----------------------------------------------------------------------------
def _matmul_kernel(*refs, pre_act, post_act, use_bias, collect_bn, bf16_act):
    it = iter(refs)
    a_ref = next(it)
    b_ref = next(it)
    bias_ref = next(it) if use_bias else None
    o_ref = next(it)
    if collect_bn:
        sum_ref = next(it)
        sq_ref = next(it)

    a = a_ref[...]
    if not bf16_act:                       # v5-and-older: no bf16 VPU -> activate in f32
        a = a.astype(jnp.float32)
    if pre_act == "lrelu":                 # nn.LeakyReLU(0.2) on the conv input
        a = jnp.where(a > 0, a, 0.2 * a)
    elif pre_act == "relu":                # nn.ReLU on the (transposed-)conv input
        a = jnp.maximum(a, 0)
    a = a.astype(jnp.bfloat16)

    acc = jnp.dot(a, b_ref[...], preferred_element_type=jnp.float32)   # bf16 MXU, f32 acc
    if use_bias:
        acc = acc + bias_ref[...]
    if post_act == "tanh":                 # nn.Tanh on the outermost up-branch
        acc = jnp.tanh(acc)
    o_ref[...] = acc.astype(o_ref.dtype)   # bf16 store (f32 on the outermost layer)

    if collect_bn:                         # BatchNorm batch stats fused into the epilogue
        @pl.when(pl.program_id(0) == 0)
        def _():
            sum_ref[...] = jnp.zeros_like(sum_ref)
            sq_ref[...] = jnp.zeros_like(sq_ref)
        sum_ref[...] += jnp.sum(acc, axis=0, keepdims=True)
        sq_ref[...] += jnp.sum(acc * acc, axis=0, keepdims=True)


def pallas_matmul(a, b, bias=None, *, pre_act="none", post_act="none",
                  collect_bn_stats=False, out_dtype=jnp.bfloat16, max_rows=None):
    """activation(a) @ b (+ bias) (+ tanh) [+ per-column sum / sum-of-squares].

    a: (M, K) patch matrix (bf16 preferred).  b: (K, Nc) weights; columns zero-padded
    to a multiple of 128 so stores are lane-dense.  Tiled over M with BlockSpec
    pipelining; the M axis is "parallel" unless BN statistics are collected (then the
    resident stat accumulators require sequential "arbitrary" semantics).
    """
    M, K = a.shape
    K2, Nc = b.shape
    assert K == K2
    # padded rows must produce exactly-zero outputs for the stats to stay unbiased
    assert not (collect_bn_stats and (bias is not None or post_act != "none"))

    Ncp = max(128, _round_up(Nc, 128))
    b = b.astype(jnp.bfloat16)
    if Ncp != Nc:
        b = jnp.pad(b, ((0, 0), (0, Ncp - Nc)))
    use_bias = bias is not None
    if use_bias:
        bias = bias.reshape(1, Nc).astype(jnp.float32)
        if Ncp != Nc:
            bias = jnp.pad(bias, ((0, 0), (0, Ncp - Nc)))

    if max_rows is None:
        max_rows = _DEFAULT_MAX_ROWS
    a_item = jnp.dtype(a.dtype).itemsize
    out_item = jnp.dtype(out_dtype).itemsize
    row_bytes = K * a_item + Ncp * out_item
    tm, Mp = _pick_rows(M, row_bytes=row_bytes, max_rows=max_rows, budget=_ROW_BUDGET)
    if Mp != M:
        a = jnp.pad(a, ((0, Mp - M), (0, 0)))   # zero rows -> zero outputs (no bias here)

    b_bytes = K * Ncp * 2
    need = (2 * tm * row_bytes + 2 * b_bytes
            + (2 * Ncp * 4 if use_bias else 0)
            + (4 * Ncp * 4 if collect_bn_stats else 0) + (4 << 20))
    vmem_limit = int(min(_VMEM_CAP, max(32 * 2**20, need)))

    kern = functools.partial(_matmul_kernel, pre_act=pre_act, post_act=post_act,
                             use_bias=use_bias, collect_bn=collect_bn_stats,
                             bf16_act=_BF16_ELEMENTWISE)
    in_specs = [pl.BlockSpec((tm, K), lambda i: (i, 0)),
                pl.BlockSpec((K, Ncp), lambda i: (0, 0))]
    args = [a, b]
    if use_bias:                                # only DMA a bias when the layer has one
        in_specs.append(pl.BlockSpec((1, Ncp), lambda i: (0, 0)))
        args.append(bias)

    if collect_bn_stats:
        out_shape = (jax.ShapeDtypeStruct((Mp, Ncp), out_dtype),
                     jax.ShapeDtypeStruct((1, Ncp), jnp.float32),
                     jax.ShapeDtypeStruct((1, Ncp), jnp.float32))
        out_specs = (pl.BlockSpec((tm, Ncp), lambda i: (i, 0)),
                     pl.BlockSpec((1, Ncp), lambda i: (0, 0)),
                     pl.BlockSpec((1, Ncp), lambda i: (0, 0)))
        semantics = ("arbitrary",)
    else:
        out_shape = jax.ShapeDtypeStruct((Mp, Ncp), out_dtype)
        out_specs = pl.BlockSpec((tm, Ncp), lambda i: (i, 0))
        semantics = ("parallel",)

    flops = 2 * Mp * K * Ncp
    transcend = Mp * Ncp if post_act == "tanh" else 0
    bytes_acc = (Mp * K * a_item + K * Ncp * 2 + Mp * Ncp * out_item
                 + (Ncp * 4 if use_bias else 0)
                 + (2 * Ncp * 4 if collect_bn_stats else 0))

    results = pl.pallas_call(
        kern,
        out_shape=out_shape,
        grid=(Mp // tm,),
        in_specs=in_specs,
        out_specs=out_specs,
        compiler_params=pltpu.CompilerParams(
            dimension_semantics=semantics,
            vmem_limit_bytes=vmem_limit),
        cost_estimate=pl.CostEstimate(flops=flops, transcendentals=transcend,
                                      bytes_accessed=bytes_acc),
    )(*args)

    if collect_bn_stats:
        out, s, q = results
        return out[:M, :Nc], s[0, :Nc], q[0, :Nc]
    return results[:M, :Nc]


def _bn_from_sums(s, q, count, gamma, beta, *, eps=1e-5, groups=1):
    """Training-mode BatchNorm folded to an affine from fused sum / sum-of-squares.
    groups>1 folds the per-phase column groups of the sub-pixel ConvTranspose."""
    if groups > 1:
        cout = s.shape[0] // groups
        s = s.reshape(groups, cout).sum(0)
        q = q.reshape(groups, cout).sum(0)
        count = count * groups
    mean = s / count
    # TODO(synk): E[x^2]-E[x]^2 in f32 can cancel for large-mean activations; clamped >= 0.
    var = jnp.maximum(q / count - mean * mean, 0.0)
    scale = gamma * jax.lax.rsqrt(var + eps)
    shift = beta - mean * scale
    return scale, shift


# ----------------------------------------------------------------------------
# Plain-JAX glue: NHWC patch extraction (fuses with the lazy BN affine) + weights
# ----------------------------------------------------------------------------
def _apply_pending_affine(rep):
    data, scale, shift = rep
    if scale is None:
        return data
    return data * scale + shift        # fuses into the im2col pad/slice/concat in XLA


def conv_down(rep, w, *, pre_act, bn_params=None):
    # nn.Conv2d(Cin, Cout, kernel=4, stride=2, padding=1, bias=False), NHWC.
    # LeakyReLU/ReLU + the following BatchNorm's statistics are fused into the matmul.
    x = _apply_pending_affine(rep)
    N, H, W, Cin = x.shape
    Cout = w.shape[0]
    Ho, Wo = H // 2, W // 2
    xp = jnp.pad(x, ((0, 0), (1, 1), (1, 1), (0, 0)))
    cols = [xp[:, kh:kh + 2 * Ho:2, kw:kw + 2 * Wo:2, :]
            for kh in range(4) for kw in range(4)]
    patches = jnp.concatenate(cols, axis=-1).reshape(N * Ho * Wo, 16 * Cin)
    patches = patches.astype(jnp.bfloat16)
    b_mat = w.transpose(2, 3, 1, 0).reshape(16 * Cin, Cout)   # rows ordered (kh, kw, ci)
    if bn_params is None:
        out = pallas_matmul(patches, b_mat, pre_act=pre_act)
        return (out.reshape(N, Ho, Wo, Cout), None, None)
    out, s, q = pallas_matmul(patches, b_mat, pre_act=pre_act, collect_bn_stats=True)
    gamma, beta = bn_params
    scale, shift = _bn_from_sums(s, q, N * Ho * Wo, gamma, beta)
    return (out.reshape(N, Ho, Wo, Cout), scale, shift)


# phase -> {3x3-neighborhood offset d (0,1,2 ~ rows r-1,r,r+1) : ConvT kernel tap index}
_PHASE_TAPS = {0: {0: 3, 1: 1}, 1: {1: 2, 2: 0}}


def _convT_weight_mat(w_t):
    """(Cin, Cout, 4, 4) ConvTranspose2d weight -> (9*Cin, 4*Cout) sub-pixel matrix.
    Row order (dh, dw, ci) over the 3x3 input neighborhood, column order (ph, pw, co)
    over the four output phases; only the 2x2 taps each phase actually uses are non-zero."""
    Cin, Cout = w_t.shape[0], w_t.shape[1]
    mat = jnp.zeros((9 * Cin, 4 * Cout), w_t.dtype)
    for ph in (0, 1):
        for pw in (0, 1):
            c0 = (ph * 2 + pw) * Cout
            for dh, kh in _PHASE_TAPS[ph].items():
                for dw, kw in _PHASE_TAPS[pw].items():
                    r0 = (dh * 3 + dw) * Cin
                    mat = mat.at[r0:r0 + Cin, c0:c0 + Cout].set(w_t[:, :, kh, kw])
    return mat


def conv_up(rep, w_t, bias_vec=None, *, pre_act, post_act="none", bn_params=None,
            out_dtype=jnp.bfloat16):
    # nn.ConvTranspose2d(Cin, Cout, kernel=4, stride=2, padding=1), NHWC, via sub-pixel
    # phase decomposition: one matmul over a 3x3 neighborhood emits all four output
    # phases (no zero-dilated input; ReLU(0)=0 keeps the border padding exact).
    x = _apply_pending_affine(rep)
    N, H, W, Cin = x.shape
    Cout = w_t.shape[1]
    xp = jnp.pad(x, ((0, 0), (1, 1), (1, 1), (0, 0)))
    cols = [xp[:, dh:dh + H, dw:dw + W, :] for dh in range(3) for dw in range(3)]
    patches = jnp.concatenate(cols, axis=-1).reshape(N * H * W, 9 * Cin)
    patches = patches.astype(jnp.bfloat16)
    b_mat = _convT_weight_mat(w_t)
    bias4 = None if bias_vec is None else jnp.tile(bias_vec, 4)  # per-phase copies
    if bn_params is None:
        out = pallas_matmul(patches, b_mat, bias4, pre_act=pre_act, post_act=post_act,
                            out_dtype=out_dtype)
        s = q = None
    else:
        out, s, q = pallas_matmul(patches, b_mat, bias4, pre_act=pre_act,
                                  post_act=post_act, collect_bn_stats=True,
                                  out_dtype=out_dtype)
    # TODO(synk): phase interleave is a plain-XLA transpose; could be folded into the
    # kernel's store pattern or the next layer's gather to save one memory pass.
    out = out.reshape(N, H, W, 2, 2, Cout)
    out = out.transpose(0, 1, 3, 2, 4, 5).reshape(N, 2 * H, 2 * W, Cout)
    if bn_params is None:
        return (out, None, None)
    gamma, beta = bn_params
    scale, shift = _bn_from_sums(s, q, N * H * W, gamma, beta, groups=4)
    return (out, scale, shift)


def _concat_skip(x_rep, u_rep):
    """torch.cat([x, u], dim=1) in NHWC, carrying any pending per-channel BN affines."""
    xd, xs, xh = x_rep
    ud, us, uh = u_rep
    data = jnp.concatenate([xd, ud], axis=-1)
    if xs is None and us is None:
        return (data, None, None)
    cx, cu = xd.shape[-1], ud.shape[-1]
    xs = jnp.ones((cx,), jnp.float32) if xs is None else xs
    xh = jnp.zeros((cx,), jnp.float32) if xh is None else xh
    us = jnp.ones((cu,), jnp.float32) if us is None else us
    uh = jnp.zeros((cu,), jnp.float32) if uh is None else uh
    return (data, jnp.concatenate([xs, us]), jnp.concatenate([xh, uh]))


# ----------------------------------------------------------------------------
# UnetGenerator parameters (deterministic synthetic init) and forward pass
# ----------------------------------------------------------------------------
def make_unet_params(key, input_c=1, output_c=2, num_downs=5, num_filters=8):
    keys = iter(jax.random.split(key, 256))

    def w(shape):
        return 0.05 * jax.random.normal(next(keys), shape, jnp.float32)

    def block(nf, ni, submodule=None, input_c=None, dropout=False,
              innermost=False, outermost=False):
        if input_c is None:
            input_c = nf
        p = {"sub": submodule, "dropout": dropout}
        p["down_w"] = w((ni, input_c, 4, 4))                      # Conv2d(input_c, ni)
        if outermost:
            p["type"] = "outer"
            p["up_w"] = w((ni * 2, nf, 4, 4))                     # ConvT(ni*2, nf) + bias
            p["up_bias"] = 0.05 * jax.random.normal(next(keys), (nf,), jnp.float32)
        elif innermost:
            p["type"] = "inner"
            p["up_w"] = w((ni, nf, 4, 4))                         # ConvT(ni, nf)
            p["up_g"], p["up_b"] = jnp.ones((nf,), jnp.float32), jnp.zeros((nf,), jnp.float32)
        else:
            p["type"] = "middle"
            p["dn_g"], p["dn_b"] = jnp.ones((ni,), jnp.float32), jnp.zeros((ni,), jnp.float32)
            p["up_w"] = w((ni * 2, nf, 4, 4))                     # ConvT(ni*2, nf)
            p["up_g"], p["up_b"] = jnp.ones((nf,), jnp.float32), jnp.zeros((nf,), jnp.float32)
        return p

    ub = block(num_filters * 8, num_filters * 8, innermost=True)
    for _ in range(num_downs - 5):
        ub = block(num_filters * 8, num_filters * 8, submodule=ub, dropout=True)
    ub = block(num_filters * 4, num_filters * 8, submodule=ub)
    ub = block(num_filters * 2, num_filters * 4, submodule=ub)
    ub = block(num_filters, num_filters * 2, submodule=ub)
    return block(output_c, num_filters, input_c=input_c, submodule=ub, outermost=True)


def apply_block(p, rep):
    t = p["type"]
    if t == "outer":
        h = conv_down(rep, p["down_w"], pre_act="none")            # down = [downconv]
        s = apply_block(p["sub"], h)
        out, _, _ = conv_up(s, p["up_w"], p["up_bias"], pre_act="relu", post_act="tanh",
                            out_dtype=jnp.float32)                 # up = [ReLU, ConvT, Tanh]
        return out
    if t == "inner":
        h = conv_down(rep, p["down_w"], pre_act="lrelu")           # [LeakyReLU, Conv]
        u = conv_up(h, p["up_w"], pre_act="relu",                  # [ReLU, ConvT, upnorm]
                    bn_params=(p["up_g"], p["up_b"]))
        return _concat_skip(rep, u)
    # middle block
    h = conv_down(rep, p["down_w"], pre_act="lrelu",               # [LeakyReLU, Conv, BN]
                  bn_params=(p["dn_g"], p["dn_b"]))
    s = apply_block(p["sub"], h)
    u = conv_up(s, p["up_w"], pre_act="relu",                      # [ReLU, ConvT, BN]
                bn_params=(p["up_g"], p["up_b"]))
    # TODO(synk): nn.Dropout(0.5) (training-mode RNG) not applied; no dropout blocks exist
    # for the num_downs=5 demo configuration.
    return _concat_skip(rep, u)


def unet_forward(params, x_nchw):
    x = x_nchw.transpose(0, 2, 3, 1)            # NCHW -> NHWC once at the boundary
    y = apply_block(params, (x, None, None))    # outermost returns plain NHWC data (f32)
    return y.transpose(0, 3, 1, 2)              # back to NCHW (PyTorch layout)


if __name__ == "__main__":
    key = jax.random.PRNGKey(0)
    pkey, xkey, k1, k2 = jax.random.split(key, 4)

    # --- sanity: tiled fused matmul (relu pre-act, bf16 store, row padding) ------------
    am = jax.random.normal(k1, (1030, 96), jnp.float32).astype(jnp.bfloat16)
    bm = jax.random.normal(k2, (96, 24), jnp.float32)
    got = pallas_matmul(am, bm, pre_act="relu", max_rows=256)      # 5 row tiles + row pad
    ref = jnp.dot(jnp.maximum(am.astype(jnp.float32), 0.0).astype(jnp.bfloat16).astype(jnp.float32),
                  bm.astype(jnp.bfloat16).astype(jnp.float32))
    assert jnp.allclose(got.astype(jnp.float32), ref, rtol=2e-2, atol=2e-2), "matmul mismatch"

    # --- sanity: BatchNorm statistics fused into the matmul epilogue -------------------
    got2, s, q = pallas_matmul(am, bm, pre_act="relu", collect_bn_stats=True, max_rows=256)
    assert jnp.allclose(s, ref.sum(0), rtol=1e-2, atol=1e-2), "fused BN sum mismatch"
    assert jnp.allclose(q, (ref * ref).sum(0), rtol=1e-2, atol=1.0), "fused BN sumsq mismatch"

    # --- full U-Net forward -------------------------------------------------------------
    params = make_unet_params(pkey, input_c=1, output_c=2, num_downs=5, num_filters=8)
    x = jax.random.normal(xkey, (2, 1, 32, 32), jnp.float32)       # NCHW, like PyTorch
    fwd = jax.jit(lambda inp: unet_forward(params, inp))
    y = fwd(x)
    jax.block_until_ready(y)
    assert y.shape == (2, 2, 32, 32), y.shape
    assert bool(jnp.all(jnp.isfinite(y)))
    print("KERNEL_OK")
</pallas_src>

<mosaic_0001>
module attributes {stable_mosaic.version = 11 : i64} {
  func.func @_matmul_kernel(%arg0: i32, %arg1: memref<256x96xbf16, #tpu.memory_space<vmem>>, %arg2: memref<96x128xbf16, #tpu.memory_space<vmem>>, %arg3: memref<256x128xbf16, #tpu.memory_space<vmem>>) attributes {dimension_semantics = [#tpu.dimension_semantics<parallel>], iteration_bounds = array<i64: 5>, scalar_prefetch = 0 : i64, scratch_operands = 0 : i64, tpu.core_type = #tpu.core_type<tc>, window_params = [{transform_indices = @transform_0, window_bounds = array<i64: 256, 96>}, {pipeline_mode = #tpu.pipeline_mode<synchronous>, transform_indices = @transform_1, window_bounds = array<i64: 96, 128>}, {transform_indices = @transform_2, window_bounds = array<i64: 256, 128>}]} {
    %c0 = arith.constant 0 : index
    %c0_0 = arith.constant 0 : index
    %0 = vector.load %arg1[%c0, %c0_0] : memref<256x96xbf16, #tpu.memory_space<vmem>>, vector<256x96xbf16>
    %1 = arith.extf %0 : vector<256x96xbf16> to vector<256x96xf32>
    %cst = arith.constant 0.000000e+00 : f32
    %2 = vector.broadcast %cst : f32 to vector<256x96xf32>
    %3 = arith.maximumf %1, %2 : vector<256x96xf32>
    %4 = arith.truncf %3 : vector<256x96xf32> to vector<256x96xbf16>
    %c0_1 = arith.constant 0 : index
    %c0_2 = arith.constant 0 : index
    %5 = vector.load %arg2[%c0_1, %c0_2] : memref<96x128xbf16, #tpu.memory_space<vmem>>, vector<96x128xbf16>
    %cst_3 = arith.constant dense<0.000000e+00> : vector<256x128xf32>
    %6 = tpu.matmul %4, %5, %cst_3 {dimension_numbers = #tpu.dot_dimension_numbers<[1], [0], [0], [1], [0, 0, 1, 1], [], []>} : vector<256x96xbf16>, vector<96x128xbf16>, vector<256x128xf32> -> vector<256x128xf32>
    %7 = arith.truncf %6 : vector<256x128xf32> to vector<256x128xbf16>
    %c0_4 = arith.constant 0 : index
    %c0_5 = arith.constant 0 : index
    %8 = vector.load %arg3[%c0_4, %c0_5] : memref<256x128xbf16, #tpu.memory_space<vmem>>, vector<256x128xbf16>
    tpu.vector_store %arg3[%c0_4, %c0_5], %7 {strides = array<i32>} : memref<256x128xbf16, #tpu.memory_space<vmem>>, vector<256x128xbf16>,
    return
  }
  func.func @transform_0(%arg0: i32) -> (i32, i32) {
    %c0_i32 = arith.constant 0 : i32
    %c0_i32_0 = arith.constant 0 : i32
    return %arg0, %c0_i32 : i32, i32
  }
  func.func @transform_1(%arg0: i32) -> (i32, i32) {
    %c0_i32 = arith.constant 0 : i32
    %c0_i32_0 = arith.constant 0 : i32
    %c0_i32_1 = arith.constant 0 : i32
    return %c0_i32, %c0_i32_0 : i32, i32
  }
  func.func @transform_2(%arg0: i32) -> (i32, i32) {
    %c0_i32 = arith.constant 0 : i32
    %c0_i32_0 = arith.constant 0 : i32
    return %arg0, %c0_i32 : i32, i32
  }
}

</mosaic_0001>

<bundles_post_ra>
// kernel: tpu_custom_call.1
= control target key start
LH: loop header
LB: loop body
LE: loop exit
PB: predicated region body
PF: predicated region fallthrough
CT: control target
= control target key end

     0   :  { %7 = vsyncpa [#allocation3], 0  ;;  %s1406_s0 = inlined_call_operand.vmem [shape: bf16[1280,96], index: 0, kind: input, shape index: {}]   ;;  %s1407_s1 = inlined_call_operand.vmem [shape: bf16[96,128], index: 1, kind: input, shape index: {}]   ;;  %s1408_s2 = inlined_call_operand.hbm [shape: bf16[1280,128], index: 2, kind: output, shape index: {}]  }
   0x1   :  { %9 = vsyncpa [#allocation3 + $0x1], 0  ;;  %s1230_s9 = smov 0   ;;  %s1232_s10 = smov 0  }
   0x2   :  { %s1234_s11 = smov 0   ;;  %s1236_s12 = smov 0  }
   0x3 LB: > { %s1251_s13 = sadd.s32 4294967295, %s1210_s12   ;;  %s752_s14 = sadd.s32 4294967294, %s1210_s12   ;;  %s1210_s12 = sphi %s1236_s12, %s1414_s12   ;;  %s1206_s11 = sphi %s1234_s11, %s1413_s11   ;;  %s1202_s10 = sphi %s1232_s10, %s1412_s10   ;;  %s1198_s9 = sphi %s1230_s9, %s1411_s9  }
   0x4   : > { %s1255_s15 = sadd.s32 1, %s1210_s12   ;;  %s69_s16 = sadd.s32 1, %s1206_s11 }
   0x5   : > { %s66_s17 = ssub.s32 %s1210_s12, %s1255_s15  ;;  %p79_p0 = scmp.ne.s32.totalorder %s1206_s11, %s1202_s10 }
   0x6   : > { %p67_p1 = scmp.eq.s32.totalorder %s66_s17, 0  ;;  %p80_p2 = scmp.eq.s32.totalorder %s1251_s13, 4 }
   0x7   : > { %p85_p3 = scmp.ne.s32.totalorder %s1202_s10, %s1198_s9  ;;  %p86_p4 = scmp.eq.s32.totalorder %s752_s14, 4 }
   0x8   : > { %s1266_s18 = scalar_select %p67_p1, %s1206_s11, %s69_s16  }
   0x9   : > { %p1268_p5 = por %p80_p2, %p79_p0  ;;  %p1272_p6 = por %p86_p4, %p85_p3 }
   0xa   : > { %p755_p7 = scmp.ge.s32.totalorder %s1210_s12, 1  ;;  %p116_p8 = scmp.lt.s32.totalorder %s1210_s12, 6 }
   0xc   : > { %p117_p9 = pnand %p755_p7, %p116_p8 }
   0xd   : > { %s757_s23 = sshll.u32 (!%p117_p9), %s1251_s13, 5  ;;  %s135_s16 = sand.u32 (!%p117_p9), 1, %s1202_s10  }
   0xe   : > { %120 = sbr.rel (%p117_p9) target bundleno = 283 (0x11b), region = 28  ;;  %p139_p10 = scmp.lt.s32.totalorder (!%p117_p9), %s757_s23, 159 }
   0xf   : > { %s756_s17 = sshll.u32 (!%p117_p9), %s135_s16, 7  ;;  %s850_s22 = sshll.u32 (!%p117_p9), %s1251_s13, 11 }
  0x10   : > { %s1337_s21 = scalar_lea.vmem (!%p117_p9), [#allocation2], %s756_s17  ;;  %s1356_s26 = scalar_lea.hbm (!%p117_p9), %s1408_s2, %s850_s22 }
  0x11   : > { %s1366_s13 = scalar_lea.sflag (!%p117_p9), [#allocation3], %s135_s16 }
  0x13   : > { %v1144_v0 = vld [vmem:[%s1407_s1 + $0x28] sm:$0xff]   ;;  %v1145_v1 = vld [vmem:[%s1407_s1 + $0x20] sm:$0xff]   ;;  %s1416_s23 = smov (!%p139_p10, %s757_s23), 159  ;;  %v1146_v2 = vld [vmem:[%s1407_s1 + $0x18] sm:$0xff]   ;;  %vm306_vm0 = vcmask 785408  }
  0x14   : > { %1047 = vmatprep.subr.bf16.mxu0 %v1144_v0  ;;  %1091 = vmatprep.subr.bf16.mxu1 %v1144_v0  ;;  %s758_s28 = sshll.u32 %s1416_s23, 2  ;;  %v1147_v5 = vld [vmem:[%s1407_s1 + $0x10] sm:$0xff]   ;;  %v1148_v16 = vld [vmem:[%s1407_s1 + $0x8] sm:$0xff]   ;;  %v1149_v29 = vld [vmem:[%s1407_s1] sm:$0xff]   ;;  %s690_s23 = sshll.u32 %s1337_s21, 4  ;;  %s1358_s23 = int_to_ptr.vmem [resolvable:$true] %s690_s23 }
  0x15   : > { %1048 = vmatpush3.bf16.msra.mxu0 %v1144_v0  ;;  %1097 = vmatpush3.bf16.msra.mxu1 %v1144_v0  ;;  %s1291_s3 = scalar_lea.vmem %s1406_s0, %s758_s28  ;;  %s1150_s27 = scalar_lea.vmem %s1358_s23, 2048 }
  0x16   : > { %1049 = vmatprep.subr.bf16.mxu0 %v1145_v1  ;;  %1092 = vmatprep.subr.bf16.mxu1 %v1145_v1  ;;  %v852_v3 = vld [vmem:[%s1291_s3] sm:$0xff]   ;;  %v995_v14 = vld [vmem:[%s1291_s3 + $0x8] sm:$0xff]   ;;  %v996_v19 = vld [vmem:[%s1291_s3 + $0x10] sm:$0xff]   ;;  %p1151_p11 = scmp.ne.s32.totalorder %s1358_s23, %s1150_s27  ;;  %s1212_s28 = smov [#allocation2]  }
  0x17   : > { %v1002_v4 = vld [vmem:[%s1291_s3 + $0x40] sm:$0xff]   ;;  %v853_v6 = vunpack.c.l.bf16 %v852_v3  ;;  %v854_v7 = vunpack.c.h.bf16 %v852_v3  ;;  %v1003_v15 = vld [vmem:[%s1291_s3 + $0x48] sm:$0xff]   ;;  %v1004_v20 = vld [vmem:[%s1291_s3 + $0x50] sm:$0xff]   ;;  %v857_v21 = vunpack.c.l.bf16 %v995_v14  ;;  %v858_v22 = vunpack.c.h.bf16 %v995_v14  ;;  %s1154_s29 = sshll.u32 %s1212_s28, 4  ;;  %s1155_s29 = int_to_ptr.vmem [resolvable:$false] %s1154_s29 }
  0x18   : > { %v885_v8 = vunpack.c.l.bf16 %v1002_v4  ;;  %v886_v9 = vunpack.c.h.bf16 %v1002_v4  ;;  %v889_v23 = vunpack.c.l.bf16 %v1003_v15  ;;  %v890_v24 = vunpack.c.h.bf16 %v1003_v15  ;;  %v997_v34 = vld [vmem:[%s1291_s3 + $0x18] sm:$0xff]   ;;  %v998_v40 = vld [vmem:[%s1291_s3 + $0x20] sm:$0xff]   ;;  %v999_v60 = vld [vmem:[%s1291_s3 + $0x28] sm:$0xff]   ;;  %p1152_p12 = pnand %p1151_p11, %p1268_p5  ;;  %s1156_s30 = scalar_lea.vmem %s1155_s29, 4096 }
  0x19   : > { %1050 = vmatpush3.bf16.msra.mxu0 %v1145_v1  ;;  %1098 = vmatpush3.bf16.msra.mxu1 %v1145_v1  ;;  %v210_v10 = vmax.f32 %v853_v6, 0.0  ;;  %v211_v11 = vmax.f32 %v854_v7, 0.0  ;;  %v861_v25 = vunpack.c.l.bf16 %v996_v19  ;;  %v862_v26 = vunpack.c.h.bf16 %v996_v19  ;;  %v1005_v39 = vld [vmem:[%s1291_s3 + $0x58] sm:$0xff]   ;;  %v1006_v41 = vld [vmem:[%s1291_s3 + $0x60] sm:$0xff]   ;;  %v1007_v61 = vld [vmem:[%s1291_s3 + $0x68] sm:$0xff]   ;;  %p1157_p0 = scmp.lt.s32.totalorder %s1358_s23, %s1155_s29  ;;  %p1158_p1 = scmp.lt.s32.totalorder %s1156_s30, %s1150_s27 }
  0x1a   : > { %1051 = vmatprep.subr.bf16.mxu0 %v1146_v2  ;;  %1093 = vmatprep.subr.bf16.mxu1 %v1146_v2  ;;  %v226_v12 = vmax.f32 %v885_v8, 0.0  ;;  %v227_v13 = vmax.f32 %v886_v9, 0.0  ;;  %v893_v27 = vunpack.c.l.bf16 %v1004_v20  ;;  %v894_v28 = vunpack.c.h.bf16 %v1004_v20  ;;  %v1000_v0 = vld [vmem:[%s1291_s3 + $0x30] sm:$0xff]   ;;  %p1153_p13 = pneg %p1152_p12 }
  0x1b   : > { %v242_v17 = vpack.c.bf16 %v211_v11, %v210_v10  ;;  %v212_v30 = vmax.f32 %v857_v21, 0.0  ;;  %v213_v31 = vmax.f32 %v858_v22, 0.0  ;;  %v228_v32 = vmax.f32 %v889_v23, 0.0  ;;  %v1008_v1 = vld [vmem:[%s1291_s3 + $0x70] sm:$0xff]   ;;  %v1001_v22 = vld [vmem:[%s1291_s3 + $0x38] sm:$0xff]   ;;  %p1159_p2 = por %p1158_p1, %p1157_p0 }
  0x1c   : > { %v250_v18 = vpack.c.bf16 %v227_v13, %v226_v12  ;;  %v229_v33 = vmax.f32 %v890_v24, 0.0  ;;  %v214_v35 = vmax.f32 %v861_v25, 0.0  ;;  %v215_v36 = vmax.f32 %v862_v26, 0.0  ;;  %v1009_v23 = vld [vmem:[%s1291_s3 + $0x78] sm:$0xff]  }
  0x1d   : > { %1052 = vmatpush3.bf16.msra.mxu0 %v1146_v2  ;;  %1099 = vmatpush3.bf16.msra.mxu1 %v1146_v2  ;;  %v230_v37 = vmax.f32 %v893_v27, 0.0  ;;  %v231_v38 = vmax.f32 %v894_v28, 0.0  ;;  %v243_v42 = vpack.c.bf16 %v213_v31, %v212_v30  ;;  %v865_v44 = vunpack.c.l.bf16 %v997_v34  ;;  %p1160_p3 = pnand %p1159_p2, %p1153_p13 }
  0x1e   : > { %1053 = vmatprep.subr.bf16.mxu0 %v1147_v5  ;;  %1094 = vmatprep.subr.bf16.mxu1 %v1147_v5  ;;  %v251_v43 = vpack.c.bf16 %v229_v33, %v228_v32  ;;  %v866_v45 = vunpack.c.h.bf16 %v997_v34  ;;  %v897_v46 = vunpack.c.l.bf16 %v1005_v39  ;;  %v898_v47 = vunpack.c.h.bf16 %v1005_v39 }
  0x1f   : > { %1059 = vmatprep.mubr.msk.bf16.mxu0 %vm306_vm0, %v242_v17  ;;  %1075 = vmatprep.mubr.msk.bf16.mxu1 %vm306_vm0, %v250_v18  ;;  %v869_v48 = vunpack.c.l.bf16 %v998_v40  ;;  %v870_v49 = vunpack.c.h.bf16 %v998_v40  ;;  %v244_v50 = vpack.c.bf16 %v215_v36, %v214_v35  ;;  %v252_v51 = vpack.c.bf16 %v231_v38, %v230_v37 }
  0x20   : > { %v901_v52 = vunpack.c.l.bf16 %v1006_v41  ;;  %v902_v53 = vunpack.c.h.bf16 %v1006_v41  ;;  %v216_v54 = vmax.f32 %v865_v44, 0.0  ;;  %v217_v55 = vmax.f32 %v866_v45, 0.0 }
  0x21   : > { %1054 = vmatpush3.bf16.msra.mxu0 %v1147_v5  ;;  %1100 = vmatpush3.bf16.msra.mxu1 %v1147_v5  ;;  %v232_v56 = vmax.f32 %v897_v46, 0.0  ;;  %v233_v57 = vmax.f32 %v898_v47, 0.0  ;;  %v218_v58 = vmax.f32 %v869_v48, 0.0  ;;  %v219_v59 = vmax.f32 %v870_v49, 0.0 }
  0x22   : > { %1055 = vmatprep.subr.bf16.mxu0 %v1148_v16  ;;  %1095 = vmatprep.subr.bf16.mxu1 %v1148_v16  ;;  %v234_v62 = vmax.f32 %v901_v52, 0.0  ;;  %v235_v63 = vmax.f32 %v902_v53, 0.0  ;;  %v873_v2 = vunpack.c.l.bf16 %v999_v60  ;;  %v874_v3 = vunpack.c.h.bf16 %v999_v60 }
  0x23   : > { %v905_v4 = vunpack.c.l.bf16 %v1007_v61  ;;  %v906_v5 = vunpack.c.h.bf16 %v1007_v61  ;;  %v245_v6 = vpack.c.bf16 %v217_v55, %v216_v54  ;;  %v253_v7 = vpack.c.bf16 %v233_v57, %v232_v56 }
  0x24   : > { %v246_v8 = vpack.c.bf16 %v219_v59, %v218_v58  ;;  %v877_v9 = vunpack.c.l.bf16 %v1000_v0  ;;  %v254_v10 = vpack.c.bf16 %v235_v63, %v234_v62  ;;  %v878_v11 = vunpack.c.h.bf16 %v1000_v0 }
  0x25   : > { %1056 = vmatpush3.bf16.msra.mxu0 %v1148_v16  ;;  %1101 = vmatpush3.bf16.msra.mxu1 %v1148_v16  ;;  %v909_v12 = vunpack.c.l.bf16 %v1008_v1  ;;  %v910_v13 = vunpack.c.h.bf16 %v1008_v1  ;;  %v220_v14 = vmax.f32 %v873_v2, 0.0  ;;  %v221_v15 = vmax.f32 %v874_v3, 0.0 }
  0x26   : > { %1057 = vmatprep.subr.bf16.mxu0 %v1149_v29  ;;  %1096 = vmatprep.subr.bf16.mxu1 %v1149_v29  ;;  %v236_v16 = vmax.f32 %v905_v4, 0.0  ;;  %v237_v17 = vmax.f32 %v906_v5, 0.0  ;;  %v222_v18 = vmax.f32 %v877_v9, 0.0  ;;  %v223_v19 = vmax.f32 %v878_v11, 0.0 }
  0x27   : > { %v238_v20 = vmax.f32 %v909_v12, 0.0  ;;  %v239_v21 = vmax.f32 %v910_v13, 0.0  ;;  %v247_v24 = vpack.c.bf16 %v221_v15, %v220_v14  ;;  %v881_v26 = vunpack.c.l.bf16 %v1001_v22 }
  0x28   : > { %v255_v25 = vpack.c.bf16 %v237_v17, %v236_v16  ;;  %v882_v27 = vunpack.c.h.bf16 %v1001_v22  ;;  %v913_v28 = vunpack.c.l.bf16 %v1009_v23  ;;  %v248_v30 = vpack.c.bf16 %v223_v19, %v222_v18 }
  0x29   : > { %1058 = vmatpush3.bf16.msra.mxu0 %v1149_v29  ;;  %1102 = vmatpush3.bf16.msra.mxu1 %v1149_v29  ;;  %v914_v29 = vunpack.c.h.bf16 %v1009_v23  ;;  %v256_v31 = vpack.c.bf16 %v239_v21, %v238_v20  ;;  %v224_v32 = vmax.f32 %v881_v26, 0.0 }
  0x2a   : > { %v225_v33 = vmax.f32 %v882_v27, 0.0  ;;  %v240_v34 = vmax.f32 %v913_v28, 0.0 }
  0x2b   : > { %v241_v35 = vmax.f32 %v914_v29, 0.0 }
  0x2c   : > { %1060 = vmatmul.mubr.msk.bf16.vlgmr.msra.gmra.mxu0 %vm306_vm0, %v243_v42  ;;  %1076 = vmatmul.mubr.msk.bf16.vlgmr.msra.gmra.mxu1 %vm306_vm0, %v251_v43  ;;  %v249_v36 = vpack.c.bf16 %v225_v33, %v224_v32 }
  0x2d   : > { %1063 = vmatprep.mubr.msk.bf16.mxu0 %vm306_vm0, %v244_v50  ;;  %1079 = vmatprep.mubr.msk.bf16.mxu1 %vm306_vm0, %v252_v51  ;;  %v257_v37 = vpack.c.bf16 %v241_v35, %v240_v34 }
  0x34   : > { %1064 = vmatmul.mubr.msk.bf16.gmra.mxu0 %vm306_vm0, %v245_v6  ;;  %1080 = vmatmul.mubr.msk.bf16.gmra.mxu1 %vm306_vm0, %v253_v7 }
  0x35   : > { %1067 = vmatprep.mubr.msk.bf16.mxu0 %vm306_vm0, %v246_v8  ;;  %1083 = vmatprep.mubr.msk.bf16.mxu1 %vm306_vm0, %v254_v10 }
  0x3c   : > { %1068 = vmatmul.mubr.msk.bf16.gmra.mxu0 %vm306_vm0, %v247_v24  ;;  %1084 = vmatmul.mubr.msk.bf16.gmra.mxu1 %vm306_vm0, %v255_v25 }
  0x3d   : > { %1071 = vmatprep.mubr.msk.bf16.mxu0 %vm306_vm0, %v248_v30  ;;  %1087 = vmatprep.mubr.msk.bf16.mxu1 %vm306_vm0, %v256_v31 }
  0x44   : > { %1072 = vmatmul.mubr.msk.bf16.gmra.mxu0 %vm306_vm0, %v249_v36  ;;  %1088 = vmatmul.mubr.msk.bf16.gmra.mxu1 %vm306_vm0, %v257_v37 }
  0xec   : > { %v1061_v38 = vpop.f32.mrf.mxu0  ;;  %v1077_v39 = vpop.f32.mrf.mxu1 }
  0xee   : > { %v389_v40 = vpop.f32.mrf.mxu0  ;;  %v453_v41 = vpop.f32.mrf.mxu1 }
  0xf0   : > { %v1062_v42 = vpop.f32.mrf.mxu0  ;;  %v1078_v43 = vpop.f32.mrf.mxu1 }
  0xf1   : > { %v923_v44 = vpack.c.bf16 %v1062_v42, %v1061_v38  ;;  %v963_v45 = vpack.c.bf16 %v1078_v43, %v1077_v39 }
  0xf2   : > { %v392_v46 = vpop.f32.mrf.mxu0  ;;  %v456_v47 = vpop.f32.mrf.mxu1 }
  0xf3   : > { %1010 = vst [vmem:[%s1337_s21 + $0x8] sm:$0xff] %v923_v44   ;;  %1018 = vst [vmem:[%s1337_s21 + $0x48] sm:$0xff] %v963_v45   ;;  %v918_v48 = vpack.c.bf16 %v392_v46, %v389_v40  ;;  %v958_v49 = vpack.c.bf16 %v456_v47, %v453_v41 }
  0xf4   : > { %v1065_v50 = vpop.f32.mrf.mxu0  ;;  %v1081_v51 = vpop.f32.mrf.mxu1 }
  0xf5   : > { %919 = vst [vmem:[%s1337_s21] sm:$0xff] %v918_v48   ;;  %1017 = vst [vmem:[%s1337_s21 + $0x40] sm:$0xff] %v958_v49  }
  0xf6   : > { %v405_v52 = vpop.f32.mrf.mxu0  ;;  %v469_v53 = vpop.f32.mrf.mxu1 }
  0xf8   : > { %v1066_v54 = vpop.f32.mrf.mxu0  ;;  %v1082_v55 = vpop.f32.mrf.mxu1 }
  0xf9   : > { %v933_v56 = vpack.c.bf16 %v1066_v54, %v1065_v50  ;;  %v973_v57 = vpack.c.bf16 %v1082_v55, %v1081_v51 }
  0xfa   : > { %v408_v58 = vpop.f32.mrf.mxu0  ;;  %v472_v59 = vpop.f32.mrf.mxu1 }
  0xfb   : > { %1012 = vst [vmem:[%s1337_s21 + $0x18] sm:$0xff] %v933_v56   ;;  %1020 = vst [vmem:[%s1337_s21 + $0x58] sm:$0xff] %v973_v57   ;;  %v928_v60 = vpack.c.bf16 %v408_v58, %v405_v52  ;;  %v968_v61 = vpack.c.bf16 %v472_v59, %v469_v53 }
  0xfc   : > { %v1069_v62 = vpop.f32.mrf.mxu0  ;;  %v1085_v63 = vpop.f32.mrf.mxu1 }
  0xfd   : > { %1011 = vst [vmem:[%s1337_s21 + $0x10] sm:$0xff] %v928_v60   ;;  %1019 = vst [vmem:[%s1337_s21 + $0x50] sm:$0xff] %v968_v61  }
  0xfe   : > { %v421_v0 = vpop.f32.mrf.mxu0  ;;  %v485_v1 = vpop.f32.mrf.mxu1 }
 0x100   : > { %v1070_v2 = vpop.f32.mrf.mxu0  ;;  %v1086_v3 = vpop.f32.mrf.mxu1 }
 0x101   : > { %v943_v4 = vpack.c.bf16 %v1070_v2, %v1069_v62  ;;  %v983_v5 = vpack.c.bf16 %v1086_v3, %v1085_v63 }
 0x102   : > { %v424_v6 = vpop.f32.mrf.mxu0  ;;  %v488_v7 = vpop.f32.mrf.mxu1 }
 0x103   : > { %1014 = vst [vmem:[%s1337_s21 + $0x28] sm:$0xff] %v943_v4   ;;  %1022 = vst [vmem:[%s1337_s21 + $0x68] sm:$0xff] %v983_v5   ;;  %v938_v8 = vpack.c.bf16 %v424_v6, %v421_v0  ;;  %v978_v9 = vpack.c.bf16 %v488_v7, %v485_v1 }
 0x104   : > { %v1073_v10 = vpop.f32.mrf.mxu0  ;;  %v1089_v11 = vpop.f32.mrf.mxu1 }
 0x105   : > { %1013 = vst [vmem:[%s1337_s21 + $0x20] sm:$0xff] %v938_v8   ;;  %1021 = vst [vmem:[%s1337_s21 + $0x60] sm:$0xff] %v978_v9  }
 0x106   : > { %v437_v12 = vpop.f32.mrf.mxu0  ;;  %v501_v13 = vpop.f32.mrf.mxu1 }
 0x108   : > { %v1074_v14 = vpop.f32.mrf.mxu0  ;;  %v1090_v15 = vpop.f32.mrf.mxu1 }
 0x109   : > { %v953_v16 = vpack.c.bf16 %v1074_v14, %v1073_v10  ;;  %v993_v17 = vpack.c.bf16 %v1090_v15, %v1089_v11 }
 0x10a   : > { %v440_v18 = vpop.f32.mrf.mxu0  ;;  %v504_v19 = vpop.f32.mrf.mxu1 }
 0x10b   : > { %1016 = vst [vmem:[%s1337_s21 + $0x38] sm:$0xff] %v953_v16   ;;  %1024 = vst [vmem:[%s1337_s21 + $0x78] sm:$0xff] %v993_v17   ;;  %v948_v20 = vpack.c.bf16 %v440_v18, %v437_v12  ;;  %v988_v21 = vpack.c.bf16 %v504_v19, %v501_v13 }
 0x10d   : > { %1015 = vst [vmem:[%s1337_s21 + $0x30] sm:$0xff] %v948_v20   ;;  %1023 = vst [vmem:[%s1337_s21 + $0x70] sm:$0xff] %v988_v21  }
 0x10e   : > { %1163 = shalt.err (!%p1160_p3)
}
 0x10f   : > { %s1164_s3 = scalar_lea.hbm %s1356_s26, 2048  ;;  %s1168_s6 = scalar_lea.hbm %s1408_s2, 10240 }
 0x110   : > { %p1165_p4 = scmp.ne.s32.totalorder %s1356_s26, %s1164_s3  ;;  %p1169_p9 = scmp.lt.s32.totalorder %s1356_s26, %s1408_s2 }
 0x111   : > { %p1170_p10 = scmp.lt.s32.totalorder %s1168_s6, %s1164_s3 }
 0x112   : > { %p1166_p7 = pnand %p1165_p4, %p1268_p5 }
 0x113   : > { %p1171_p11 = por %p1170_p10, %p1169_p9 }
 0x114   : > { %p1167_p8 = pneg %p1166_p7 }
 0x116   : > { %p1172_p12 = pnand %p1171_p11, %p1167_p8 }
 0x118   : > { %1175 = shalt.err (!%p1172_p12)
}
 0x119   : > { %s1213_s14 = smov 64   ;;  %s1214_s16 = smov 4  }
 0x11a   : > { %1103 = dma.vmem_to_hbm [thread:$0]  (%p1268_p5), %s1358_s23, 2048, %s1356_s26, %s1366_s13, %s1213_s14, %s1213_s14, %s1214_s16  }
 0x11b PF: > { %p1109_p13 = scmp.ge.s32.totalorder %s1210_s12, 2  ;;  %s705_s17 = sand.u32 1, %s1198_s9  }
 0x11c   : > { %s706_s21 = scalar_lea.sflag [#allocation3], %s705_s17 }
 0x11d   : > { %p1106_p0 = pnand %p1109_p13, %p1272_p6 }
 0x11f   : > { %p1107_p1 = pneg %p1106_p0 }
 0x121   : > { %1193 = dma.done.wait (%p1107_p1), %s706_s21, 2048  }
 0x122   : > { %1195 = vsyncadd (%p1107_p1), %s706_s21, 4294965248  ;;  %p12_p2 = scmp.ge.s32.totalorder %s1255_s15, 7   ;;  %s1411_s9 = smov %s1202_s10 }
 0x123   : > { %s1412_s10 = smov %s1206_s11  ;;  %s1413_s11 = smov %s1266_s18 }
 0x124   : > { %s1414_s12 = smov %s1255_s15  ;;  %14 = sbr.rel (!%p12_p2) target bundleno = 3 (0x3), region = 63 }
 0x129   :  { %711 = vsyncpa [#allocation3], 1 }
 0x12a   :  { %713 = vsyncpa [#allocation3 + $0x1], 1 }

</bundles_post_ra>
